<compile_context>
chip_gen: v7x
topology: tpu7x:2x2x1
jax: 0.10.0
libtpu: 0.0.40
codegen_flags: <defaults>
</compile_context>

<pallas_src>
import functools

import jax
import jax.numpy as jnp
from jax.experimental import pallas as pl
from jax.experimental.pallas import tpu as pltpu


def _round_up(x, m):
    return (x + m - 1) // m * m


# --------------------------------------------------------------------------------------
# Kernel: one row-tile of the fused noise-filter forward.
# --------------------------------------------------------------------------------------
def ncod_noise_filter_kernel(
    emb_ref,            # (TN, D)   graph embeddings (row tile)
    pred_ref,           # (TN, C)   classifier logits at native width
    w1_ref, b1_ref,     # (D, D), (1, D)     clean||noisy first linears (BN folded in)
    w23_ref, b23_ref,   # (D, H2), (1, H2)   fused branch-second-linear . conf/corr hidden
    w4_ref, b4_ref,     # (H2, OW), (1, OW)  correction head; confidence head in lane C
    out_ref,            # (TN, OW)  packed output slab
    *,
    num_classes,
):
    f32 = jnp.float32
    mxu_dt = w1_ref.dtype                      # f32, or bf16 on v6e/v7x if prepared so
    emb = emb_ref[...].astype(mxu_dt)
    pred = pred_ref[...].astype(f32)

    # clean || noisy branch: Linear(+folded BN) -> ReLU   (Dropout treated as identity)
    h1 = jnp.maximum(
        jnp.dot(emb, w1_ref[...], preferred_element_type=f32)
        + b1_ref[...].astype(f32), 0.0)

    # fused (branch second linear) . (confidence||correction hidden linear) -> ReLU
    h3 = jnp.maximum(
        jnp.dot(h1.astype(mxu_dt), w23_ref[...], preferred_element_type=f32)
        + b23_ref[...].astype(f32), 0.0)

    # correction head (lanes [0:C]) + confidence-head logit (lane C) in one MXU matmul;
    # lanes > C are exactly zero.
    corrected = (jnp.dot(h3.astype(mxu_dt), w4_ref[...], preferred_element_type=f32)
                 + b4_ref[...].astype(f32))                                   # (TN, OW)

    tn, ow = corrected.shape
    lane = jax.lax.broadcasted_iota(jnp.int32, (tn, ow), 1)

    # confidence = sigmoid of lane C of the slab (lane-masked XLU reduce, no extra matmul)
    conf_logit = jnp.sum(jnp.where(lane == num_classes, corrected, 0.0),
                         axis=-1, keepdims=True)                               # (TN, 1)
    conf = jax.nn.sigmoid(conf_logit)
    noise = 1.0 - conf

    # widen native-width predictions to the lane-dense slab (zeros past lane C)
    pred_w = jnp.concatenate(
        [pred, jnp.zeros((tn, ow - num_classes), f32)], axis=-1)               # (TN, OW)
    final = (1.0 - conf) * pred_w + conf * corrected

    # pack: lanes [0:C] final logits, lane C confidence, lane C+1 noise score
    out_ref[...] = jnp.where(lane == num_classes, conf,
                             jnp.where(lane == num_classes + 1, noise, final))


# --------------------------------------------------------------------------------------
# One-time parameter preparation: BN folding, slab consolidation, algebraic fusion.
# --------------------------------------------------------------------------------------
def prepare_noise_filter_params(params, *, bn_eps=1e-5, mxu_dtype=jnp.float32):
    f32 = jnp.float32
    hp = jax.lax.Precision.HIGHEST
    D = params["wc1"].shape[0]
    C = params["wcr2"].shape[1]
    assert D % 4 == 0, "hidden_dim of the noise filter must be divisible by 4"
    h2, h4 = D // 2, D // 4

    # ---- fold eval-mode BatchNorm1d into the first linear of each branch
    def fold_bn(w, b, gamma, beta, rm, rv):
        scale = gamma / jnp.sqrt(rv + bn_eps)
        return w * scale[None, :], (b - rm) * scale + beta

    wc1, bc1 = fold_bn(params["wc1"], params["bc1"],
                       params["gc"], params["betac"], params["rmc"], params["rvc"])
    wn1, bn1 = fold_bn(params["wn1"], params["bn1"],
                       params["gn"], params["betan"], params["rmn"], params["rvn"])

    # ---- clean||noisy fused first layer
    w1 = jnp.concatenate([wc1, wn1], axis=1)                        # (D, D)
    b1 = jnp.concatenate([bc1, bn1])[None, :]                       # (1, D)

    # ---- block-diagonal second layer of both branches
    w2 = jnp.zeros((D, h2), f32)
    w2 = w2.at[:h2, :h4].set(params["wc2"]).at[h2:, h4:].set(params["wn2"])
    b2 = jnp.concatenate([params["bc2"], params["bn2"]])[None, :]   # (1, h2)

    # ---- confidence||correction hidden linears
    w3 = jnp.concatenate([params["wcf1"], params["wcr1"]], axis=1)  # (h2, h2)
    b3 = jnp.concatenate([params["bcf1"], params["bcr1"]])[None, :]

    # ---- algebraic fusion: no nonlinearity between the two layers
    w23 = jnp.dot(w2, w3, precision=hp)                             # (D, h2)
    b23 = jnp.dot(b2, w3, precision=hp) + b3                        # (1, h2)

    # ---- correction head padded to a lane-dense width; confidence head folded in lane C
    out_w = max(128, _round_up(C + 2, 128))
    w4 = jnp.zeros((h2, out_w), f32)
    w4 = w4.at[h4:, :C].set(params["wcr2"])
    w4 = w4.at[:h4, C].set(params["wcf2"][:, 0])
    b4 = jnp.zeros((1, out_w), f32)
    b4 = b4.at[0, :C].set(params["bcr2"])
    b4 = b4.at[0, C].set(params["bcf2"][0])

    return dict(
        w1=w1.astype(mxu_dtype), b1=b1.astype(f32),
        w23=w23.astype(mxu_dtype), b23=b23.astype(f32),
        w4=w4.astype(mxu_dtype), b4=b4.astype(f32),
        D=D, C=C, h2=h2, out_w=out_w,
    )


# --------------------------------------------------------------------------------------
# Wrapper: grid + BlockSpecs.
# --------------------------------------------------------------------------------------
def ncod_noise_filter_forward(graph_emb, predictions, labels=None, *, prepared,
                              training=True, block_n=None):
    f32 = jnp.float32
    N, D = graph_emb.shape
    C = predictions.shape[1]
    assert D == prepared["D"] and C == prepared["C"]
    h2, out_w = prepared["h2"], prepared["out_w"]

    if block_n is None:
        block_n = min(1024, _round_up(N, 8))
    block_n = max(8, _round_up(block_n, 8))

    n_pad = _round_up(N, block_n)
    num_blocks = n_pad // block_n

    # Skip the wrapper-side HBM padding pass whenever the tile evenly divides the batch.
    if n_pad == N:
        emb_p = graph_emb.astype(f32)
        pred_p = predictions.astype(f32)
    else:
        emb_p = jnp.zeros((n_pad, D), f32).at[:N].set(graph_emb.astype(f32))
        pred_p = jnp.zeros((n_pad, C), f32).at[:N].set(predictions.astype(f32))

    row = lambda i: (i, 0)        # batch-tiled arrays
    const = lambda i: (0, 0)      # weights: fetched once, stay VMEM-resident

    grid_spec = pltpu.PrefetchScalarGridSpec(
        num_scalar_prefetch=0,
        grid=(num_blocks,),
        in_specs=[
            pl.BlockSpec((block_n, D), row),        # emb tile
            pl.BlockSpec((block_n, C), row),        # pred tile (native width)
            pl.BlockSpec((D, D), const),            # w1
            pl.BlockSpec((1, D), const),            # b1
            pl.BlockSpec((D, h2), const),           # w23
            pl.BlockSpec((1, h2), const),           # b23
            pl.BlockSpec((h2, out_w), const),       # w4 (+confidence head in lane C)
            pl.BlockSpec((1, out_w), const),        # b4
        ],
        out_specs=pl.BlockSpec((block_n, out_w), row),
    )

    matmul_flops = 2 * n_pad * (D * D + D * h2 + h2 * out_w)
    bytes_acc = 4 * (n_pad * (D + C + out_w)
                     + D * D + D * h2 + h2 * out_w
                     + D + h2 + out_w)

    slab = pl.pallas_call(
        functools.partial(ncod_noise_filter_kernel, num_classes=C),
        grid_spec=grid_spec,
        out_shape=jax.ShapeDtypeStruct((n_pad, out_w), f32),
        compiler_params=pltpu.CompilerParams(
            dimension_semantics=("parallel",),
            vmem_limit_bytes=32 * 1024 * 1024,
        ),
        cost_estimate=pl.CostEstimate(
            flops=matmul_flops, transcendentals=n_pad, bytes_accessed=bytes_acc),
    )(emb_p, pred_p,
      prepared["w1"], prepared["b1"],
      prepared["w23"], prepared["b23"],
      prepared["w4"], prepared["b4"])

    final = slab[:N, :C]
    conf = slab[:N, C:C + 1]
    noise = slab[:N, C + 1:C + 2]

    if labels is not None and training:
        return final, conf, noise
    return predictions, conf, None


# --------------------------------------------------------------------------------------
# Plain-JAX reference of the PyTorch NCODNoiseFilter training branch
# (eval-mode BN statistics, dropout = identity).
# --------------------------------------------------------------------------------------
def reference_forward(graph_emb, predictions, params, bn_eps=1e-5):
    hp = jax.lax.Precision.HIGHEST

    def branch(x, w1, b1, g, beta, rm, rv, w2, b2):
        h = jnp.dot(x, w1, precision=hp) + b1
        h = (h - rm) / jnp.sqrt(rv + bn_eps) * g + beta
        h = jnp.maximum(h, 0.0)
        return jnp.dot(h, w2, precision=hp) + b2

    clean = branch(graph_emb, params["wc1"], params["bc1"], params["gc"],
                   params["betac"], params["rmc"], params["rvc"],
                   params["wc2"], params["bc2"])
    noisy = branch(graph_emb, params["wn1"], params["bn1"], params["gn"],
                   params["betan"], params["rmn"], params["rvn"],
                   params["wn2"], params["bn2"])
    comb = jnp.concatenate([clean, noisy], axis=1)

    hcf = jnp.maximum(jnp.dot(comb, params["wcf1"], precision=hp) + params["bcf1"], 0.0)
    conf = jax.nn.sigmoid(jnp.dot(hcf, params["wcf2"], precision=hp) + params["bcf2"])

    hcr = jnp.maximum(jnp.dot(comb, params["wcr1"], precision=hp) + params["bcr1"], 0.0)
    corrected = jnp.dot(hcr, params["wcr2"], precision=hp) + params["bcr2"]

    final = (1.0 - conf) * predictions + conf * corrected
    noise = 1.0 - conf
    return final, conf, noise


def init_params(key, hidden_dim, num_classes):
    h2, h4 = hidden_dim // 2, hidden_dim // 4
    ks = jax.random.split(key, 18)

    def xavier(k, fi, fo):
        bound = (6.0 / (fi + fo)) ** 0.5
        return jax.random.uniform(k, (fi, fo), jnp.float32, -bound, bound)

    def small(k, dim):
        return 0.05 * jax.random.normal(k, (dim,), jnp.float32)

    def bn(k, dim):
        k1, k2, k3, k4 = jax.random.split(k, 4)
        return (jax.random.uniform(k1, (dim,), jnp.float32, 0.5, 1.5),   # gamma
                0.1 * jax.random.normal(k2, (dim,), jnp.float32),        # beta
                0.1 * jax.random.normal(k3, (dim,), jnp.float32),        # running_mean
                jax.random.uniform(k4, (dim,), jnp.float32, 0.5, 1.5))   # running_var

    gc, betac, rmc, rvc = bn(ks[16], h2)
    gn, betan, rmn, rvn = bn(ks[17], h2)
    return dict(
        wc1=xavier(ks[0], hidden_dim, h2), bc1=small(ks[8], h2),
        wc2=xavier(ks[1], h2, h4),         bc2=small(ks[9], h4),
        wn1=xavier(ks[2], hidden_dim, h2), bn1=small(ks[10], h2),
        wn2=xavier(ks[3], h2, h4),         bn2=small(ks[11], h4),
        wcf1=xavier(ks[4], h2, h4),        bcf1=small(ks[12], h4),
        wcf2=xavier(ks[5], h4, 1),         bcf2=small(ks[13], 1),
        wcr1=xavier(ks[6], h2, h4),        bcr1=small(ks[14], h4),
        wcr2=xavier(ks[7], h4, num_classes), bcr2=small(ks[15], num_classes),
        gc=gc, betac=betac, rmc=rmc, rvc=rvc,
        gn=gn, betan=betan, rmn=rmn, rvn=rvn,
    )


if __name__ == "__main__":
    # Small GINPlusModel: hidden_dim=32 -> pooled_dim = 3*32 = 96 feeds the noise filter,
    # out_classes=6 logits, a batch of N=64 graphs.
    HIDDEN = 32
    POOLED = 3 * HIDDEN          # 96  (noise-filter input width)
    C = 6                        # out_classes
    N = 64                       # graphs in the batch

    key = jax.random.PRNGKey(0)
    k_emb, k_pred, k_lab, k_par = jax.random.split(key, 4)
    graph_emb = jax.random.normal(k_emb, (N, POOLED), jnp.float32)
    predictions = jax.random.normal(k_pred, (N, C), jnp.float32)
    labels = jax.random.randint(k_lab, (N,), 0, C, jnp.int32)   # gates the training branch
    params = init_params(k_par, POOLED, C)

    # One-time parameter preparation (use mxu_dtype=jnp.bfloat16 on v6e/v7x for speed;
    # f32 here for strict parity with the reference tolerance).
    prepared = prepare_noise_filter_params(params, mxu_dtype=jnp.float32)

    # block_n=32 -> two grid blocks: even block count keeps both v7x TensorCores busy,
    # and 32 | 64 avoids any wrapper-side batch padding pass.
    final_logits, confidence, noise_score = ncod_noise_filter_forward(
        graph_emb, predictions, labels, prepared=prepared, training=True, block_n=32)
    jax.block_until_ready((final_logits, confidence, noise_score))

    ref_f, ref_c, ref_n = reference_forward(graph_emb, predictions, params)
    assert jnp.allclose(final_logits, ref_f, atol=2e-4, rtol=2e-4), \
        float(jnp.max(jnp.abs(final_logits - ref_f)))
    assert jnp.allclose(confidence, ref_c, atol=2e-4, rtol=2e-4)
    assert jnp.allclose(noise_score, ref_n, atol=2e-4, rtol=2e-4)

    print("KERNEL_OK")
</pallas_src>

<mosaic_0001>
module attributes {stable_mosaic.version = 11 : i64} {
  func.func @ncod_noise_filter_kernel(%arg0: i32, %arg1: memref<32x96xf32, #tpu.memory_space<vmem>>, %arg2: memref<32x6xf32, #tpu.memory_space<vmem>>, %arg3: memref<96x96xf32, #tpu.memory_space<vmem>>, %arg4: memref<1x96xf32, #tpu.memory_space<vmem>>, %arg5: memref<96x48xf32, #tpu.memory_space<vmem>>, %arg6: memref<1x48xf32, #tpu.memory_space<vmem>>, %arg7: memref<48x128xf32, #tpu.memory_space<vmem>>, %arg8: memref<1x128xf32, #tpu.memory_space<vmem>>, %arg9: memref<32x128xf32, #tpu.memory_space<vmem>>) attributes {dimension_semantics = [#tpu.dimension_semantics<parallel>], iteration_bounds = array<i64: 2>, scalar_prefetch = 0 : i64, scratch_operands = 0 : i64, tpu.core_type = #tpu.core_type<tc>, window_params = [{transform_indices = @transform_0, window_bounds = array<i64: 32, 96>}, {transform_indices = @transform_1, window_bounds = array<i64: 32, 6>}, {pipeline_mode = #tpu.pipeline_mode<synchronous>, transform_indices = @transform_2, window_bounds = array<i64: 96, 96>}, {pipeline_mode = #tpu.pipeline_mode<synchronous>, transform_indices = @transform_3, window_bounds = array<i64: 1, 96>}, {pipeline_mode = #tpu.pipeline_mode<synchronous>, transform_indices = @transform_4, window_bounds = array<i64: 96, 48>}, {pipeline_mode = #tpu.pipeline_mode<synchronous>, transform_indices = @transform_5, window_bounds = array<i64: 1, 48>}, {pipeline_mode = #tpu.pipeline_mode<synchronous>, transform_indices = @transform_6, window_bounds = array<i64: 48, 128>}, {pipeline_mode = #tpu.pipeline_mode<synchronous>, transform_indices = @transform_7, window_bounds = array<i64: 1, 128>}, {transform_indices = @transform_8, window_bounds = array<i64: 32, 128>}]} {
    %c0 = arith.constant 0 : index
    %c0_0 = arith.constant 0 : index
    %0 = vector.load %arg1[%c0, %c0_0] : memref<32x96xf32, #tpu.memory_space<vmem>>, vector<32x96xf32>
    %c0_1 = arith.constant 0 : index
    %c0_2 = arith.constant 0 : index
    %1 = vector.load %arg2[%c0_1, %c0_2] : memref<32x6xf32, #tpu.memory_space<vmem>>, vector<32x6xf32>
    %c0_3 = arith.constant 0 : index
    %c0_4 = arith.constant 0 : index
    %2 = vector.load %arg3[%c0_3, %c0_4] : memref<96x96xf32, #tpu.memory_space<vmem>>, vector<96x96xf32>
    %cst = arith.constant dense<0.000000e+00> : vector<32x96xf32>
    %3 = tpu.matmul %0, %2, %cst {dimension_numbers = #tpu.dot_dimension_numbers<[1], [0], [0], [1], [0, 0, 1, 1], [], []>} : vector<32x96xf32>, vector<96x96xf32>, vector<32x96xf32> -> vector<32x96xf32>
    %c0_5 = arith.constant 0 : index
    %c0_6 = arith.constant 0 : index
    %4 = vector.load %arg4[%c0_5, %c0_6] : memref<1x96xf32, #tpu.memory_space<vmem>>, vector<1x96xf32>
    %5 = vector.broadcast %4 : vector<1x96xf32> to vector<32x96xf32>
    %6 = arith.addf %3, %5 : vector<32x96xf32>
    %cst_7 = arith.constant 0.000000e+00 : f32
    %7 = vector.broadcast %cst_7 : f32 to vector<32x96xf32>
    %8 = arith.maximumf %6, %7 : vector<32x96xf32>
    %c0_8 = arith.constant 0 : index
    %c0_9 = arith.constant 0 : index
    %9 = vector.load %arg5[%c0_8, %c0_9] : memref<96x48xf32, #tpu.memory_space<vmem>>, vector<96x48xf32>
    %cst_10 = arith.constant dense<0.000000e+00> : vector<32x48xf32>
    %10 = tpu.matmul %8, %9, %cst_10 {dimension_numbers = #tpu.dot_dimension_numbers<[1], [0], [0], [1], [0, 0, 1, 1], [], []>} : vector<32x96xf32>, vector<96x48xf32>, vector<32x48xf32> -> vector<32x48xf32>
    %c0_11 = arith.constant 0 : index
    %c0_12 = arith.constant 0 : index
    %11 = vector.load %arg6[%c0_11, %c0_12] : memref<1x48xf32, #tpu.memory_space<vmem>>, vector<1x48xf32>
    %12 = vector.broadcast %11 : vector<1x48xf32> to vector<32x48xf32>
    %13 = arith.addf %10, %12 : vector<32x48xf32>
    %cst_13 = arith.constant 0.000000e+00 : f32
    %14 = vector.broadcast %cst_13 : f32 to vector<32x48xf32>
    %15 = arith.maximumf %13, %14 : vector<32x48xf32>
    %c0_14 = arith.constant 0 : index
    %c0_15 = arith.constant 0 : index
    %16 = vector.load %arg7[%c0_14, %c0_15] : memref<48x128xf32, #tpu.memory_space<vmem>>, vector<48x128xf32>
    %cst_16 = arith.constant dense<0.000000e+00> : vector<32x128xf32>
    %17 = tpu.matmul %15, %16, %cst_16 {dimension_numbers = #tpu.dot_dimension_numbers<[1], [0], [0], [1], [0, 0, 1, 1], [], []>} : vector<32x48xf32>, vector<48x128xf32>, vector<32x128xf32> -> vector<32x128xf32>
    %c0_17 = arith.constant 0 : index
    %c0_18 = arith.constant 0 : index
    %18 = vector.load %arg8[%c0_17, %c0_18] : memref<1x128xf32, #tpu.memory_space<vmem>>, vector<1x128xf32>
    %19 = vector.broadcast %18 : vector<1x128xf32> to vector<32x128xf32>
    %20 = arith.addf %17, %19 : vector<32x128xf32>
    %21 = tpu.iota {dimensions = array<i32: 1>} : vector<32x128xi32>
    %c6_i32 = arith.constant 6 : i32
    %22 = vector.broadcast %c6_i32 : i32 to vector<32x128xi32>
    %23 = arith.cmpi eq, %21, %22 : vector<32x128xi32>
    %cst_19 = arith.constant 0.000000e+00 : f32
    %24 = vector.broadcast %cst_19 : f32 to vector<32x128xf32>
    %25 = arith.select %23, %20, %24 : vector<32x128xi1>, vector<32x128xf32>
    %cst_20 = arith.constant dense<0.000000e+00> : vector<32xf32>
    %26 = vector.multi_reduction <add>, %25, %cst_20 [1] : vector<32x128xf32> to vector<32xf32>
    %27 = vector.shape_cast %26 : vector<32xf32> to vector<32x1xf32>
    %28 = arith.negf %27 : vector<32x1xf32>
    %29 = math.exp %28 : vector<32x1xf32>
    %cst_21 = arith.constant 1.000000e+00 : f32
    %30 = vector.broadcast %cst_21 : f32 to vector<32x1xf32>
    %31 = arith.addf %30, %29 : vector<32x1xf32>
    %32 = arith.divf %30, %31 : vector<32x1xf32>
    %cst_22 = arith.constant 1.000000e+00 : f32
    %33 = vector.broadcast %cst_22 : f32 to vector<32x1xf32>
    %34 = arith.subf %33, %32 : vector<32x1xf32>
    %cst_23 = arith.constant 0.000000e+00 : f32
    %35 = vector.broadcast %cst_23 : f32 to vector<32x122xf32>
    %36 = tpu.concatenate %1, %35 in 1 : vector<32x6xf32>, vector<32x122xf32> -> vector<32x128xf32>
    %cst_24 = arith.constant 1.000000e+00 : f32
    %37 = vector.broadcast %cst_24 : f32 to vector<32x1xf32>
    %38 = arith.subf %37, %32 : vector<32x1xf32>
    %39 = vector.broadcast %38 : vector<32x1xf32> to vector<32x128xf32>
    %40 = arith.mulf %39, %36 : vector<32x128xf32>
    %41 = vector.broadcast %32 : vector<32x1xf32> to vector<32x128xf32>
    %42 = arith.mulf %41, %20 : vector<32x128xf32>
    %43 = arith.addf %40, %42 : vector<32x128xf32>
    %c6_i32_25 = arith.constant 6 : i32
    %44 = vector.broadcast %c6_i32_25 : i32 to vector<32x128xi32>
    %45 = arith.cmpi eq, %21, %44 : vector<32x128xi32>
    %c7_i32 = arith.constant 7 : i32
    %46 = vector.broadcast %c7_i32 : i32 to vector<32x128xi32>
    %47 = arith.cmpi eq, %21, %46 : vector<32x128xi32>
    %48 = vector.shape_cast %34 : vector<32x1xf32> to vector<32x1xf32>
    %49 = vector.broadcast %48 : vector<32x1xf32> to vector<32x128xf32>
    %50 = arith.select %47, %49, %43 : vector<32x128xi1>, vector<32x128xf32>
    %51 = vector.shape_cast %32 : vector<32x1xf32> to vector<32x1xf32>
    %52 = vector.broadcast %51 : vector<32x1xf32> to vector<32x128xf32>
    %53 = arith.select %45, %52, %50 : vector<32x128xi1>, vector<32x128xf32>
    %c0_26 = arith.constant 0 : index
    %c0_27 = arith.constant 0 : index
    %54 = vector.load %arg9[%c0_26, %c0_27] : memref<32x128xf32, #tpu.memory_space<vmem>>, vector<32x128xf32>
    tpu.vector_store %arg9[%c0_26, %c0_27], %53 {strides = array<i32>} : memref<32x128xf32, #tpu.memory_space<vmem>>, vector<32x128xf32>,
    return
  }
  func.func @transform_0(%arg0: i32) -> (i32, i32) {
    %c0_i32 = arith.constant 0 : i32
    %c0_i32_0 = arith.constant 0 : i32
    return %arg0, %c0_i32 : i32, i32
  }
  func.func @transform_1(%arg0: i32) -> (i32, i32) {
    %c0_i32 = arith.constant 0 : i32
    %c0_i32_0 = arith.constant 0 : i32
    return %arg0, %c0_i32 : i32, i32
  }
  func.func @transform_2(%arg0: i32) -> (i32, i32) {
    %c0_i32 = arith.constant 0 : i32
    %c0_i32_0 = arith.constant 0 : i32
    %c0_i32_1 = arith.constant 0 : i32
    return %c0_i32, %c0_i32_0 : i32, i32
  }
  func.func @transform_3(%arg0: i32) -> (i32, i32) {
    %c0_i32 = arith.constant 0 : i32
    %c0_i32_0 = arith.constant 0 : i32
    %c0_i32_1 = arith.constant 0 : i32
    return %c0_i32, %c0_i32_0 : i32, i32
  }
  func.func @transform_4(%arg0: i32) -> (i32, i32) {
    %c0_i32 = arith.constant 0 : i32
    %c0_i32_0 = arith.constant 0 : i32
    %c0_i32_1 = arith.constant 0 : i32
    return %c0_i32, %c0_i32_0 : i32, i32
  }
  func.func @transform_5(%arg0: i32) -> (i32, i32) {
    %c0_i32 = arith.constant 0 : i32
    %c0_i32_0 = arith.constant 0 : i32
    %c0_i32_1 = arith.constant 0 : i32
    return %c0_i32, %c0_i32_0 : i32, i32
  }
  func.func @transform_6(%arg0: i32) -> (i32, i32) {
    %c0_i32 = arith.constant 0 : i32
    %c0_i32_0 = arith.constant 0 : i32
    %c0_i32_1 = arith.constant 0 : i32
    return %c0_i32, %c0_i32_0 : i32, i32
  }
  func.func @transform_7(%arg0: i32) -> (i32, i32) {
    %c0_i32 = arith.constant 0 : i32
    %c0_i32_0 = arith.constant 0 : i32
    %c0_i32_1 = arith.constant 0 : i32
    return %c0_i32, %c0_i32_0 : i32, i32
  }
  func.func @transform_8(%arg0: i32) -> (i32, i32) {
    %c0_i32 = arith.constant 0 : i32
    %c0_i32_0 = arith.constant 0 : i32
    return %arg0, %c0_i32 : i32, i32
  }
}

</mosaic_0001>

<bundles_post_ra>
// kernel: tpu_custom_call.1
= control target key start
LH: loop header
LB: loop body
LE: loop exit
PB: predicated region body
PF: predicated region fallthrough
CT: control target
= control target key end

     0   :  { %13 = vsyncpa [#allocation3], 0  ;;  %s1508_s0 = inlined_call_operand.vmem [shape: f32[64,96], index: 0, kind: input, shape index: {}]   ;;  %s1509_s1 = inlined_call_operand.vmem [shape: f32[64,6], index: 1, kind: input, shape index: {}]   ;;  %s1510_s2 = inlined_call_operand.vmem [shape: f32[96,96], index: 2, kind: input, shape index: {}]   ;;  %s1511_s3 = inlined_call_operand.vmem [shape: f32[1,96], index: 3, kind: input, shape index: {}]   ;;  %s1512_s4 = inlined_call_operand.vmem [shape: f32[96,48], index: 4, kind: input, shape index: {}]   ;;  %s1513_s5 = inlined_call_operand.vmem [shape: f32[1,48], index: 5, kind: input, shape index: {}]   ;;  %s1514_s6 = inlined_call_operand.vmem [shape: f32[48,128], index: 6, kind: input, shape index: {}]   ;;  %s1515_s7 = inlined_call_operand.vmem [shape: f32[1,128], index: 7, kind: input, shape index: {}]   ;;  %s1516_s8 = inlined_call_operand.hbm [shape: f32[64,128], index: 8, kind: output, shape index: {}]  }
   0x1   :  { %15 = vsyncpa [#allocation3 + $0x1], 0  ;;  %s1239_s27 = smov 0   ;;  %s1241_s28 = smov 0  }
   0x2   :  { %s1243_s29 = smov 0   ;;  %s1245_s30 = smov 0  }
   0x3 LB: > { %s1260_s9 = sadd.s32 4294967295, %s1189_s30   ;;  %s850_s10 = sadd.s32 4294967294, %s1189_s30   ;;  %s1189_s30 = sphi %s1245_s30, %s1522_s30   ;;  %s1185_s29 = sphi %s1243_s29, %s1521_s29   ;;  %s1181_s28 = sphi %s1241_s28, %s1520_s28   ;;  %s1177_s27 = sphi %s1239_s27, %s1519_s27  }
   0x4   : > { %s1264_s11 = sadd.s32 1, %s1189_s30   ;;  %s206_s12 = sadd.s32 1, %s1185_s29 }
   0x5   : > { %s203_s13 = ssub.s32 %s1189_s30, %s1264_s11  ;;  %p216_p0 = scmp.ne.s32.totalorder %s1185_s29, %s1181_s28 }
   0x6   : > { %p204_p1 = scmp.eq.s32.totalorder %s203_s13, 0  ;;  %p217_p2 = scmp.eq.s32.totalorder %s1260_s9, 1 }
   0x7   : > { %p222_p3 = scmp.ne.s32.totalorder %s1181_s28, %s1177_s27  ;;  %p223_p4 = scmp.eq.s32.totalorder %s850_s10, 1 }
   0x8   : > { %s1275_s14 = scalar_select %p204_p1, %s1185_s29, %s206_s12  }
   0x9   : > { %p1277_p5 = por %p217_p2, %p216_p0  ;;  %p1281_p6 = por %p223_p4, %p222_p3 }
   0xa   : > { %p853_p7 = scmp.ge.s32.totalorder %s1189_s30, 1  ;;  %p277_p8 = scmp.lt.s32.totalorder %s1189_s30, 3 }
   0xc   : > { %p278_p9 = pnand %p853_p7, %p277_p8 }
   0xd   : > { %v337_v0 = vld [vmem:[%s1510_s2] sm:$0xff] (!%p278_p9)  ;;  %v338_v1 = vld [vmem:[%s1510_s2 + $0x8] sm:$0xff] (!%p278_p9)  ;;  %v339_v2 = vld [vmem:[%s1510_s2 + $0x10] sm:$0xff] (!%p278_p9)  ;;  %s855_s23 = sshll.u32 (!%p278_p9), %s1260_s9, 2  ;;  %vm356_vm0 = vcmask (!%p278_p9), 785408   ;;  %vm591_vm1 = vcmask (!%p278_p9), 392192  }
   0xe   : > { %281 = sbr.rel (%p278_p9) target bundleno = 891 (0x37b), region = 52  ;;  %v1004_v3 = vpack.c.bf16 (!%p278_p9), %v338_v1, %v337_v0  ;;  %v340_v4 = vld [vmem:[%s1510_s2 + $0x18] sm:$0xff] (!%p278_p9)  ;;  %p317_p10 = scmp.lt.s32.totalorder (!%p278_p9), %s855_s23, 7  ;;  %v341_v6 = vld [vmem:[%s1510_s2 + $0x20] sm:$0xff] (!%p278_p9)  ;;  %v342_v7 = vld [vmem:[%s1510_s2 + $0x28] sm:$0xff] (!%p278_p9)  ;;  %vm732_vm3 = vcmask (!%p278_p9), 48128  }
   0xf   : > { %v1008_v5 = vpack.c.bf16 (!%p278_p9), %v340_v4, %v339_v2  ;;  %v458_v8 = vld [vmem:[%s1512_s4] sm:$0xff] (!%p278_p9)  ;;  %v459_v9 = vld [vmem:[%s1512_s4 + $0x8] sm:$0xff] (!%p278_p9)  ;;  %v460_v10 = vld [vmem:[%s1512_s4 + $0x10] sm:$0xff] (!%p278_p9)  ;;  %v1012_v11 = vpack.c.bf16 (!%p278_p9), %v342_v7, %v341_v6  ;;  %s313_s26 = sand.u32 (!%p278_p9), 1, %s1181_s28   ;;  %s883_s10 = sshll.u32 (!%p278_p9), %s1260_s9, 9 }
  0x10   : > { %1005 = vmatprep.subr.bf16.mxu0 (!%p278_p9), %v1004_v3  ;;  %v1028_v12 = vpack.c.bf16 (!%p278_p9), %v459_v9, %v458_v8  ;;  %v461_v13 = vld [vmem:[%s1512_s4 + $0x18] sm:$0xff] (!%p278_p9)  ;;  %v343_v14 = vld [vmem:[%s1510_s2 + $0x30] sm:$0xff] (!%p278_p9)  ;;  %v462_v18 = vld [vmem:[%s1512_s4 + $0x20] sm:$0xff] (!%p278_p9)  ;;  %s1467_s9 = scalar_lea.sflag (!%p278_p9), [#allocation3], %s313_s26  ;;  %s1191_s19 = smov (!%p278_p9), [#allocation2]  }
  0x11   : > { %1007 = vmatpush3.bf16.msra.mxu0 (!%p278_p9), %v1004_v3  ;;  %v344_v15 = vld [vmem:[%s1510_s2 + $0x38] sm:$0xff] (!%p278_p9)  ;;  %v1032_v16 = vpack.c.bf16 (!%p278_p9), %v461_v13, %v460_v10  ;;  %v463_v19 = vld [vmem:[%s1512_s4 + $0x28] sm:$0xff] (!%p278_p9)  ;;  %v345_v21 = vld [vmem:[%s1510_s2 + $0x40] sm:$0xff] (!%p278_p9)  ;;  %s1131_s21 = sshll.u32 (!%p278_p9), %s1191_s19, 4  ;;  %s1132_s21 = int_to_ptr.vmem [resolvable:$false] %s1131_s21 }
  0x12   : > { %1009 = vmatprep.subr.bf16.mxu0 (!%p278_p9), %v1008_v5  ;;  %1029 = vmatprep.subr.bf16.mxu1 (!%p278_p9), %v1028_v12  ;;  %v1016_v20 = vpack.c.bf16 (!%p278_p9), %v344_v15, %v343_v14  ;;  %v346_v22 = vld [vmem:[%s1510_s2 + $0x48] sm:$0xff] (!%p278_p9)  ;;  %v1036_v23 = vpack.c.bf16 (!%p278_p9), %v463_v19, %v462_v18  ;;  %v464_v24 = vld [vmem:[%s1512_s4 + $0x30] sm:$0xff] (!%p278_p9)  ;;  %v465_v25 = vld [vmem:[%s1512_s4 + $0x38] sm:$0xff] (!%p278_p9)  ;;  %s1133_s22 = scalar_lea.vmem (!%p278_p9), %s1132_s21, 1024 }
  0x13   : > { %1031 = vmatpush3.bf16.msra.mxu1 (!%p278_p9), %v1028_v12  ;;  %v1020_v26 = vpack.c.bf16 (!%p278_p9), %v346_v22, %v345_v21  ;;  %v347_v27 = vld [vmem:[%s1510_s2 + $0x50] sm:$0xff] (!%p278_p9)  ;;  %v348_v28 = vld [vmem:[%s1510_s2 + $0x58] sm:$0xff] (!%p278_p9)  ;;  %v1040_v29 = vpack.c.bf16 (!%p278_p9), %v465_v25, %v464_v24  ;;  %v466_v30 = vld [vmem:[%s1512_s4 + $0x40] sm:$0xff] (!%p278_p9) }
  0x14   : > { %1033 = vmatprep.subr.bf16.mxu1 (!%p278_p9), %v1032_v16  ;;  %v467_v31 = vld [vmem:[%s1512_s4 + $0x48] sm:$0xff] (!%p278_p9)  ;;  %v1024_v32 = vpack.c.bf16 (!%p278_p9), %v348_v28, %v347_v27  ;;  %v468_v37 = vld [vmem:[%s1512_s4 + $0x50] sm:$0xff] (!%p278_p9)  ;;  %v469_v38 = vld [vmem:[%s1512_s4 + $0x58] sm:$0xff] (!%p278_p9) }
  0x15   : > { %s1524_s23 = smov (!%p317_p10, %s855_s23), 7  ;;  %1011 = vmatpush3.bf16.msra.mxu0 %v1008_v5  ;;  %v1044_v33 = vpack.c.bf16 %v467_v31, %v466_v30  ;;  %v1048_v39 = vpack.c.bf16 %v469_v38, %v468_v37  ;;  %v578_v40 = vld [vmem:[%s1514_s6] sm:$0xff]  ;;  %v579_v41 = vld [vmem:[%s1514_s6 + $0x8] sm:$0xff]  ;;  %v580_v42 = vld [vmem:[%s1514_s6 + $0x10] sm:$0xff] }
  0x16   : > { %s856_s24 = sshll.u32 %s1524_s23, 3  ;;  %1013 = vmatprep.subr.bf16.mxu0 %v1012_v11  ;;  %v1052_v43 = vpack.c.bf16 %v579_v41, %v578_v40  ;;  %v581_v44 = vld [vmem:[%s1514_s6 + $0x18] sm:$0xff]  ;;  %v859_v46 = vld [vmem:[%s1511_s3] ss:$0 sm:$0xff]  ;;  %v583_v60 = vld [vmem:[%s1514_s6 + $0x28] sm:$0xff]  ;;  %s854_s23 = sshll.u32 %s313_s26, 5 }
  0x17   : > { %s1332_s20 = scalar_lea.vmem %s1508_s0, %s856_s24  ;;  %1035 = vmatpush3.bf16.msra.mxu1 %v1032_v16  ;;  %v1056_v45 = vpack.c.bf16 %v581_v44, %v580_v42  ;;  %v582_v59 = vld [vmem:[%s1514_s6 + $0x20] sm:$0xff]  ;;  %s326_s25 = scalar_lea.vmem %s1509_s1, %s856_s24 }
  0x18   : > { %v329_v17 = vld [vmem:[%s1332_s20] sm:$0xff]  ;;  %1037 = vmatprep.subr.bf16.mxu1 %v1036_v23  ;;  %v330_v34 = vld [vmem:[%s1332_s20 + $0x8] sm:$0xff]  ;;  %v331_v35 = vld [vmem:[%s1332_s20 + $0x10] sm:$0xff]  ;;  %v1060_v61 = vpack.c.bf16 %v583_v60, %v582_v59  ;;  %s315_s24 = scalar_lea.vmem [#allocation2], %s854_s23 }
  0x19   : > { %950 = vmatprep.mubr.msk.f32.mxu0 %vm356_vm0, %v329_v17  ;;  %1015 = vmatpush3.bf16.msra.mxu0 %v1012_v11  ;;  %v332_v36 = vld [vmem:[%s1332_s20 + $0x18] sm:$0xff]  ;;  %v864_v62 = vld [vmem:[%s1513_s5] ss:$0 sm:$0xff]  ;;  %v689_v11 = vlaneseq  ;;  %s776_s12 = sshll.u32 %s315_s24, 4  ;;  %s1457_s20 = scalar_lea.hbm %s1516_s8, %s883_s10  ;;  %s1459_s12 = int_to_ptr.vmem [resolvable:$true] %s776_s12 }
  0x1a   : > { %1017 = vmatprep.subr.bf16.mxu0 %v1016_v20  ;;  %v869_v13 = vld [vmem:[%s1515_s7] ss:$0 sm:$0xff]  ;;  %s1127_s18 = scalar_lea.vmem %s1459_s12, 512  ;;  %p1134_p0 = scmp.lt.s32.totalorder %s1459_s12, %s1132_s21 }
  0x1b   : > { %1039 = vmatpush3.bf16.msra.mxu1 %v1036_v23  ;;  %v1406_v12 = vand.u32 127, %v689_v11  ;;  %v333_v42 = vld [vmem:[%s326_s25] sm:$0xff]  ;;  %p1128_p11 = scmp.ne.s32.totalorder %s1459_s12, %s1127_s18  ;;  %p1135_p1 = scmp.lt.s32.totalorder %s1133_s22, %s1127_s18 }
  0x1c   : > { %1041 = vmatprep.subr.bf16.mxu1 %v1040_v29  ;;  %v733_v44 = vsel %vm732_vm3, %v333_v42, 0.0 }
  0x1d   : > { %1019 = vmatpush3.bf16.msra.mxu0 %v1016_v20  ;;  %vm691_vm2 = vcmp.eq.s32.totalorder %v1406_v12, 6  ;;  %vm749_vm4 = vcmp.eq.s32.totalorder %v1406_v12, 7  ;;  %p1129_p12 = pnand %p1128_p11, %p1277_p5  ;;  %p1136_p2 = por %p1135_p1, %p1134_p0 }
  0x1e   : > { %1021 = vmatprep.subr.bf16.mxu0 %v1020_v26 }
  0x1f   : > { %1043 = vmatpush3.bf16.msra.mxu1 %v1040_v29  ;;  %p1130_p13 = pneg %p1129_p12 }
  0x20   : > { %1045 = vmatprep.subr.bf16.mxu1 %v1044_v33 }
  0x21   : > { %1023 = vmatpush3.bf16.msra.mxu0 %v1020_v26  ;;  %p1137_p3 = pnand %p1136_p2, %p1130_p13 }
  0x22   : > { %1025 = vmatprep.subr.bf16.mxu0 %v1024_v32 }
  0x23   : > { %1047 = vmatpush3.bf16.msra.mxu1 %v1044_v33 }
  0x24   : > { %1049 = vmatprep.subr.bf16.mxu1 %v1048_v39 }
  0x25   : > { %1027 = vmatpush3.bf16.msra.mxu0 %v1024_v32 }
  0x26   : > { %1053 = vmatprep.subr.bf16.mxu0 %v1052_v43 }
  0x27   : > { %1051 = vmatpush3.bf16.msra.mxu1 %v1048_v39 }
  0x28   : > { %951 = vmatmul.mubr.msk.f32.vlgmr.msra.gmra.mrb[0].mxu0 %vm356_vm0, %v330_v34  ;;  %1064 = vmatprep.subr.bf16.mxu1 %v1052_v43 }
  0x29   : > { %953 = vmatprep.mubr.msk.f32.mxu0 %vm356_vm0, %v331_v35  ;;  %1055 = vmatpush3.bf16.msra.mxu0 %v1052_v43 }
  0x2a   : > { %1057 = vmatprep.subr.bf16.mxu0 %v1056_v45 }
  0x2c   : > { %954 = vmatmul.mubr.msk.f32.gmra.mrb[2].mxu0 %vm356_vm0, %v332_v36 }
  0x2d   : > { %1059 = vmatpush3.bf16.msra.mxu0 %v1056_v45 }
  0x2e   : > { %1061 = vmatprep.subr.bf16.mxu0 %v1060_v61 }
  0x31   : > { %1063 = vmatpush3.bf16.msra.mxu0 %v1060_v61 }
  0xfb   : > { %v952_v47 = vpop.f32.mrb[0].mxu0 }
  0xfc   : > { %v441_v48 = vadd.f32 %v952_v47, %v859_v46  ;;  %v435_v49 = vpop.f32.mrb[1].mxu0  ;;  %v334_v47 = vld [vmem:[%s326_s25 + $0x8] sm:$0xff] }
  0xfd   : > { %v436_v50 = vadd.f32 %v859_v46, %v435_v49 }
  0xfe   : > { %v455_v53 = vmax.f32 %v441_v48, 0.0 }
  0xff   : > { %v454_v51 = vmax.f32 %v436_v50, 0.0  ;;  %v955_v52 = vpop.f32.mrb[2].mxu0 }
 0x100   : > { %v451_v54 = vadd.f32 %v955_v52, %v859_v46  ;;  %v445_v55 = vpop.f32.mrb[3].mxu0 }
 0x101   : > { %v446_v56 = vadd.f32 %v859_v46, %v445_v55  ;;  %980 = vmatprep.mubr.msk.f32.mxu1 %vm356_vm0, %v454_v51 }
 0x102   : > { %981 = vmatmul.mubr.msk.f32.vlgmr.msra.gmra.mrb[0].mxu1 %vm356_vm0, %v455_v53  ;;  %v457_v58 = vmax.f32 %v451_v54, 0.0  ;;  %v336_v53 = vld [vmem:[%s326_s25 + $0x18] sm:$0xff]  ;;  %v734_v54 = vsel %vm732_vm3, %v334_v47, 0.0 }
 0x103   : > { %v456_v57 = vmax.f32 %v446_v56, 0.0  ;;  %1067 = vmatpush3.bf16.msra.mxu1 %v1052_v43 }
 0x104   : > { %1065 = vmatprep.subr.bf16.mxu1 %v1056_v45 }
 0x105   : > { %983 = vmatprep.mubr.msk.f32.mxu1 %vm356_vm0, %v456_v57 }
 0x106   : > { %984 = vmatmul.mubr.msk.f32.gmra.mrb[2].mxu1 %vm356_vm0, %v457_v58 }
 0x107   : > { %1068 = vmatpush3.bf16.msra.mxu1 %v1056_v45  ;;  %v335_v45 = vld [vmem:[%s326_s25 + $0x10] sm:$0xff] }
 0x108   : > { %1066 = vmatprep.subr.bf16.mxu1 %v1060_v61  ;;  %v735_v51 = vsel %vm732_vm3, %v335_v45, 0.0 }
 0x10b   : > { %1069 = vmatpush3.bf16.msra.mxu1 %v1060_v61 }
 0x1d5   : > { %v982_v63 = vpop.f32.mrb[0].mxu1 }
 0x1d6   : > { %v561_v0 = vadd.f32 %v982_v63, %v864_v62  ;;  %v555_v1 = vpop.f32.mrb[1].mxu1 }
 0x1d7   : > { %v556_v2 = vadd.f32 %v864_v62, %v555_v1 }
 0x1d8   : > { %v575_v5 = vmax.f32 %v561_v0, 0.0 }
 0x1d9   : > { %v574_v3 = vmax.f32 %v556_v2, 0.0  ;;  %v985_v4 = vpop.f32.mrb[2].mxu1 }
 0x1da   : > { %v571_v6 = vadd.f32 %v985_v4, %v864_v62  ;;  %v565_v7 = vpop.f32.mrb[3].mxu1 }
 0x1db   : > { %v566_v8 = vadd.f32 %v864_v62, %v565_v7  ;;  %998 = vmatprep.mubr.msk.f32.mxu0 %vm591_vm1, %v574_v3  ;;  %v736_v62 = vsel %vm732_vm3, %v336_v53, 0.0 }
 0x1dc   : > { %999 = vmatmul.mubr.msk.f32.vlgmr.msra.gmra.mrb[4].mxu0 %vm591_vm1, %v575_v5  ;;  %v577_v10 = vmax.f32 %v571_v6, 0.0 }
 0x1dd   : > { %v576_v9 = vmax.f32 %v566_v8, 0.0 }
 0x1df   : > { %1001 = vmatprep.mubr.msk.f32.mxu1 %vm591_vm1, %v576_v9 }
 0x1e0   : > { %1002 = vmatmul.mubr.msk.f32.vlgmr.msra.gmra.mrb[4].mxu1 %vm591_vm1, %v577_v10 }
 0x2af   : > { %v1000_v14 = vpop.f32.mrb[4].mxu0 }
 0x2b0   : > { %v670_v15 = vpop.f32.mrb[5].mxu0  ;;  %v1412_v17 = vadd.f32 %v1000_v14, %v869_v13 }
 0x2b1   : > { %v671_v16 = vadd.f32 %v869_v13, %v670_v15 }
 0x2b2   : > { %v693_v24 = vsel %vm691_vm2, %v1412_v17, 0.0 }
 0x2b3   : > { %v1003_v18 = vpop.f32.mrb[4].mxu1  ;;  %v692_v19 = vsel %vm691_vm2, %v671_v16, 0.0 }
 0x2b4   : > { %v680_v20 = vpop.f32.mrb[5].mxu1  ;;  %696 = vadd.xlane.f32.xlu0 %v692_v19  ;;  %v1416_v22 = vadd.f32 %v1003_v18, %v869_v13 }
 0x2b5   : > { %v681_v21 = vadd.f32 %v869_v13, %v680_v20 }
 0x2b6   : > { %v695_v25 = vsel %vm691_vm2, %v1416_v22, 0.0 }
 0x2b7   : > { %v694_v23 = vsel %vm691_vm2, %v681_v21, 0.0 }
 0x2b8   : > { %700 = vadd.xlane.f32.xlu1 %v694_v23  ;;  %698 = vadd.xlane.f32.xlu0 %v693_v24 }
 0x2bc   : > { %702 = vadd.xlane.f32.xlu1 %v695_v25 }
 0x341   : > { %v697_v26 = vpop.xlane.xlu0 %696 }
 0x342   : > { %v874_v27 = vmul.f32 -1.442695, %v697_v26 }
 0x344   : > { %1111 = vpow2.f32 %v874_v27 }
 0x345   : > { %v701_v28 = vpop.xlane.xlu1 %700  ;;  %v699_v29 = vpop.xlane.xlu0 %698 }
 0x346   : > { %v876_v30 = vmul.f32 -1.442695, %v701_v28  ;;  %v875_v31 = vmul.f32 -1.442695, %v699_v29 }
 0x348   : > { %1113 = vpow2.f32 %v876_v30 }
 0x349   : > { %1115 = vpow2.f32 %v875_v31  ;;  %v703_v32 = vpop.xlane.xlu1 %702 }
 0x34a   : > { %v877_v33 = vmul.f32 -1.442695, %v703_v32 }
 0x34c   : > { %1117 = vpow2.f32 %v877_v33 }
 0x34e   : > { %v1112_v34 = vpop.eup %1111 }
 0x34f   : > { %v716_v35 = vadd.f32 1.0, %v1112_v34 }
 0x351   : > { %1119 = vrcp.f32 %v716_v35 }
 0x352   : > { %v1114_v36 = vpop.eup %1113 }
 0x353   : > { %v1116_v37 = vpop.eup %1115  ;;  %v718_v38 = vadd.f32 1.0, %v1114_v36 }
 0x354   : > { %v717_v39 = vadd.f32 1.0, %v1116_v37 }
 0x355   : > { %1121 = vrcp.f32 %v718_v38 }
 0x356   : > { %v1118_v40 = vpop.eup %1117  ;;  %1123 = vrcp.f32 %v717_v39 }
 0x357   : > { %v719_v41 = vadd.f32 1.0, %v1118_v40 }
 0x359   : > { %1125 = vrcp.f32 %v719_v41 }
 0x35b   : > { %v1120_v43 = vpop.eup %1119 }
 0x35c   : > { %v728_v46 = vsub.f32 1.0, %v1120_v43  ;;  %v741_v48 = vmul.f32 %v1120_v43, %v671_v16 }
 0x35e   : > { %v737_v49 = vmul.f32 %v733_v44, %v728_v46 }
 0x35f   : > { %v1122_v50 = vpop.eup %1121 }
 0x360   : > { %v1124_v52 = vpop.eup %1123  ;;  %v730_v55 = vsub.f32 1.0, %v1122_v50  ;;  %v745_v56 = vadd.f32 %v741_v48, %v737_v49  ;;  %v743_v58 = vmul.f32 %v1122_v50, %v681_v21 }
 0x361   : > { %v729_v57 = vsub.f32 1.0, %v1124_v52  ;;  %v742_v63 = vmul.f32 %v1124_v52, %v1412_v17 }
 0x362   : > { %v739_v59 = vmul.f32 %v735_v51, %v730_v55  ;;  %v750_v60 = vsel %vm749_vm4, %v728_v46, %v745_v56 }
 0x363   : > { %v1126_v61 = vpop.eup %1125  ;;  %v738_v0 = vmul.f32 %v734_v54, %v729_v57  ;;  %v754_v1 = vsel %vm691_vm2, %v1120_v43, %v750_v60 }
 0x364   : > { %v731_v2 = vsub.f32 1.0, %v1126_v61  ;;  %v747_v3 = vadd.f32 %v743_v58, %v739_v59  ;;  %758 = vst [vmem:[%s315_s24] sm:$0xff] %v754_v1  ;;  %v744_v5 = vmul.f32 %v1126_v61, %v1416_v22 }
 0x365   : > { %v746_v4 = vadd.f32 %v742_v63, %v738_v0 }
 0x366   : > { %v740_v6 = vmul.f32 %v736_v62, %v731_v2  ;;  %v752_v7 = vsel %vm749_vm4, %v730_v55, %v747_v3 }
 0x367   : > { %v751_v8 = vsel %vm749_vm4, %v729_v57, %v746_v4  ;;  %v756_v9 = vsel %vm691_vm2, %v1122_v50, %v752_v7 }
 0x368   : > { %v748_v10 = vadd.f32 %v744_v5, %v740_v6  ;;  %v755_v11 = vsel %vm691_vm2, %v1124_v52, %v751_v8  ;;  %760 = vst [vmem:[%s315_s24 + $0x10] sm:$0xff] %v756_v9 }
 0x369   : > { %759 = vst [vmem:[%s315_s24 + $0x8] sm:$0xff] %v755_v11 }
 0x36a   : > { %v753_v13 = vsel %vm749_vm4, %v731_v2, %v748_v10 }
 0x36b   : > { %v757_v14 = vsel %vm691_vm2, %v1126_v61, %v753_v13 }
 0x36c   : > { %761 = vst [vmem:[%s315_s24 + $0x18] sm:$0xff] %v757_v14 }
 0x36d   : > { %1140 = shalt.err (!%p1137_p3)
}
 0x36e   : > { %s1141_s25 = scalar_lea.hbm %s1457_s20, 512  ;;  %s1145_s24 = scalar_lea.hbm %s1516_s8, 1024 }
 0x36f   : > { %p1142_p4 = scmp.ne.s32.totalorder %s1457_s20, %s1141_s25  ;;  %p1146_p9 = scmp.lt.u32.totalorder %s1457_s20, %s1516_s8 }
 0x370   : > { %p1147_p10 = scmp.lt.u32.totalorder %s1145_s24, %s1141_s25  ;;  %p1149_p12 = scmp.lt.u32.totalorder %s1141_s25, %s1457_s20 }
 0x371   : > { %p1143_p7 = pnand %p1142_p4, %p1277_p5 }
 0x372   : > { %p1148_p11 = por %p1147_p10, %p1146_p9 }
 0x373   : > { %p1144_p8 = pneg %p1143_p7 }
 0x374   : > { %p1150_p13 = por %p1149_p12, %p1148_p11 }
 0x376   : > { %p1151_p0 = pnand %p1150_p13, %p1144_p8 }
 0x378   : > { %1154 = shalt.err (!%p1151_p0)
}
 0x379   : > { %s1192_s17 = smov 128   ;;  %s1193_s18 = smov 8  }
 0x37a   : > { %1070 = dma.vmem_to_hbm [thread:$0]  (%p1277_p5), %s1459_s12, 512, %s1457_s20, %s1467_s9, %s1192_s17, %s1192_s17, %s1193_s18  }
 0x37b PF: > { %p1076_p1 = scmp.ge.s32.totalorder %s1189_s30, 2  ;;  %s791_s19 = sand.u32 1, %s1177_s27  }
 0x37c   : > { %s792_s21 = scalar_lea.sflag [#allocation3], %s791_s19 }
 0x37d   : > { %p1073_p2 = pnand %p1076_p1, %p1281_p6 }
 0x37f   : > { %1172 = dma.done.wait (!%p1073_p2), %s792_s21, 512  }
 0x380   : > { %1174 = vsyncadd (!%p1073_p2), %s792_s21, 4294966784  ;;  %p18_p3 = scmp.ge.s32.totalorder %s1264_s11, 4   ;;  %s1519_s27 = smov %s1181_s28 }
 0x381   : > { %s1520_s28 = smov %s1185_s29  ;;  %s1521_s29 = smov %s1275_s14 }
 0x382   : > { %s1522_s30 = smov %s1264_s11  ;;  %20 = sbr.rel (!%p18_p3) target bundleno = 3 (0x3), region = 90 }
 0x389   :  { %797 = vsyncpa [#allocation3], 1 }
 0x38a   :  { %799 = vsyncpa [#allocation3 + $0x1], 1 }

</bundles_post_ra>
